<compile_context>
chip_gen: v7x
topology: tpu7x:2x2x1
jax: 0.10.0
libtpu: 0.0.40
codegen_flags: <defaults>
</compile_context>

<pallas_src>
import functools

import jax
import jax.numpy as jnp
from jax.experimental import pallas as pl
from jax.experimental.pallas import tpu as pltpu


def _patch_embed_kernel(x_ref, w_ref, b_ref, o_ref, pbuf_ref, *, p, pc, gw, tm):
    """One grid step: tm patch-rows (= tm*gw patches) -> (tm, gw, E) embeddings.

    x_ref    : (tm, p, gw*pc) raw NHWC image rows in their native dtype; the
               lane axis interleaves (gx, dx, c).
    w_ref    : (K, E) with K = p*p*C, rows ordered (dy, dx, c); VMEM-resident
               (constant index_map), compute dtype.
    b_ref    : (1, E) f32 bias; VMEM-resident.
    o_ref    : (tm, gw, E) output embeddings.
    pbuf_ref : (gw*tm, K) scratch -- de-interleaved patch matrix for ALL gw
               patch columns of this row tile (rows ordered gx-major).
    """
    cdtype = pbuf_ref.dtype
    # 1) De-interleave every patch column into ONE patch matrix.  The copies
    #    also cast native-dtype pixels to the compute dtype.  All gather work
    #    is issued before the single matmul (one big MXU push per grid step).
    for gx in range(gw):
        for dy in range(p):
            pbuf_ref[gx * tm:(gx + 1) * tm, dy * pc:(dy + 1) * pc] = (
                x_ref[:, dy, gx * pc:(gx + 1) * pc].astype(cdtype))
    # 2) Single (gw*tm, K) @ (K, E) matmul, f32 accumulation, f32 bias add.
    acc = jnp.dot(pbuf_ref[...], w_ref[...], preferred_element_type=jnp.float32)
    acc = (acc + b_ref[...].astype(jnp.float32)).astype(o_ref.dtype)
    # 3) Lane-dense (full-E) per-column stores.
    for gx in range(gw):
        o_ref[:, gx, :] = acc[gx * tm:(gx + 1) * tm, :]


def prepare_patch_embed_params(conv_weight, bias, *, compute_dtype=jnp.bfloat16):
    """One-time rearrangement of the PyTorch Conv2d weight (E, C, p, p) into the
    (K, E) matmul layout used by the kernel (K rows ordered (dy, dx, c)).
    Do this at model init / param load, NOT per forward call."""
    E, C, p, p2 = conv_weight.shape
    assert p == p2, "square patches expected"
    w_mat = jnp.transpose(conv_weight, (2, 3, 1, 0)).reshape(p * p * C, E)
    if compute_dtype is not None:
        w_mat = w_mat.astype(compute_dtype)
    b_row = bias.reshape(1, E).astype(jnp.float32)
    return w_mat, b_row


def _pick_vmem_budget():
    """Generation-aware (budget, vmem_limit) in bytes."""
    try:
        phys = int(pltpu.get_tpu_info().vmem_capacity_bytes)
    except Exception:
        phys = 64 * 1024 * 1024
    if phys >= 96 * 1024 * 1024:                 # v5e / v6e: 128 MiB physical
        return 40 * 1024 * 1024, 64 * 1024 * 1024
    return 20 * 1024 * 1024, 32 * 1024 * 1024    # v7x: 64 MiB per TensorCore


def patch_embed_nhwc(x, w_mat, b_row, *, patch_size, tm_rows=None,
                     out_dtype=None, vmem_limit_bytes=None):
    """Hot path.  x: (B, H, W, C) channels-last, native dtype (no wrapper cast).
    Returns (B, num_patches, E) in the compute dtype unless out_dtype is set."""
    B, H, W, C = x.shape
    p = patch_size
    K, E = w_mat.shape
    assert K == C * p * p, (K, C, p)
    gh, gw = H // p, W // p
    if (gh * p, gw * p) != (H, W):   # Conv2d(stride=p) drops the ragged border
        x = x[:, :gh * p, :gw * p, :]
    pc = p * C                # lane width of one patch inside an NHWC image row
    wc = gw * pc              # full lane width of one image row (= W*C)
    n_rows = B * gh           # "patch rows"; each holds gw patches
    in_dtype = x.dtype        # read natively; cast happens in-kernel
    c_dtype = w_mat.dtype
    out_dtype = out_dtype or c_dtype

    # Free, row-major-preserving reshape: (B, H, W, C) -> (B*gh, p, W*C).
    x3 = x.reshape(n_rows, p, wc)

    in_b = jnp.dtype(in_dtype).itemsize
    c_b = jnp.dtype(c_dtype).itemsize
    out_b = jnp.dtype(out_dtype).itemsize

    budget, auto_limit = _pick_vmem_budget()
    if vmem_limit_bytes is None:
        vmem_limit_bytes = auto_limit

    # ---- tile selection --------------------------------------------------
    if tm_rows is None:
        fixed = 2 * K * E * c_b + 2 * E * 4               # resident W + bias
        per_row = (2 * p * wc * in_b                      # input blk (dbl buf)
                   + 2 * gw * E * out_b                   # output blk (dbl buf)
                   + gw * K * c_b                         # patch-matrix scratch
                   + gw * E * 4)                          # f32 acc temp
        tm = max(1, (budget - fixed) // per_row)
        tm = min(tm, max(1, pl.cdiv(n_rows, 4)))  # >=4 grid steps when possible
        tm = min(tm, n_rows)
        if tm >= 8:
            tm = (tm // 8) * 8        # sublane-aligned pbuf / output slices
    else:
        tm = int(min(tm_rows, n_rows))
    tm = max(1, int(tm))
    grid = (pl.cdiv(n_rows, tm),)     # ragged last block -> masked by Pallas

    kernel = functools.partial(_patch_embed_kernel, p=p, pc=pc, gw=gw, tm=tm)

    n_patches_total = n_rows * gw
    cost = pl.CostEstimate(
        flops=2 * n_patches_total * K * E,
        transcendentals=0,
        bytes_accessed=(x3.size * in_b + K * E * c_b + E * 4
                        + n_patches_total * E * out_b))

    out = pl.pallas_call(
        kernel,
        out_shape=jax.ShapeDtypeStruct((n_rows, gw, E), out_dtype),
        grid_spec=pltpu.PrefetchScalarGridSpec(
            num_scalar_prefetch=0,
            grid=grid,
            in_specs=[
                # image rows: move with the grid (double-buffered pipeline)
                pl.BlockSpec((tm, p, wc), lambda i: (i, 0, 0)),
                # weight & bias: constant index_map -> VMEM-resident
                pl.BlockSpec((K, E), lambda i: (0, 0)),
                pl.BlockSpec((1, E), lambda i: (0, 0)),
            ],
            out_specs=pl.BlockSpec((tm, gw, E), lambda i: (i, 0, 0)),
            scratch_shapes=[pltpu.VMEM((gw * tm, K), c_dtype)],
        ),
        compiler_params=pltpu.CompilerParams(
            dimension_semantics=("parallel",),     # shards rows across TCs
            vmem_limit_bytes=int(vmem_limit_bytes)),
        cost_estimate=cost,
    )(x3, w_mat, b_row)

    # (B*gh, gw, E) -> (B, gh*gw, E): free reshape; patch order gy*gw + gx
    # matches PyTorch's proj(x).flatten(2).transpose(1, 2).
    return out.reshape(B, gh * gw, E)


def patch_embed(x_nchw, conv_weight, bias, *, patch_size, **kwargs):
    """PyTorch-parity entry point: NCHW input + Conv2d (E, C, p, p) weight.
    For production, call prepare_patch_embed_params once at init and feed
    NHWC activations to patch_embed_nhwc directly (this wrapper's transpose and
    weight re-layout are one-off conveniences, not the hot path)."""
    w_mat, b_row = prepare_patch_embed_params(conv_weight, bias)
    x_nhwc = jnp.transpose(x_nchw, (0, 2, 3, 1))
    return patch_embed_nhwc(x_nhwc, w_mat, b_row, patch_size=patch_size, **kwargs)


if __name__ == "__main__":
    # Small but non-degenerate shapes (module defaults give a single patch):
    # 2x2 patch grid, 3 channels, lane-aligned embed_dim so the batched in-kernel
    # gather + single matmul and the tiled grid are actually exercised.
    B, C, img_size, patch_size, embed_dim = 2, 3, 16, 8, 128

    key = jax.random.PRNGKey(0)
    kx, kw, kb = jax.random.split(key, 3)
    # Image generated directly in NHWC (channels-last) f32: the kernel input
    # path has no transpose and no standalone dtype-cast pass.
    x_nhwc = jax.random.normal(kx, (B, img_size, img_size, C), dtype=jnp.float32)
    weight = jax.random.normal(
        kw, (embed_dim, C, patch_size, patch_size), dtype=jnp.float32) * 0.02
    bias = jax.random.normal(kb, (embed_dim,), dtype=jnp.float32) * 0.02

    # One-time weight rearrangement to (K, E) matmul layout (bf16 operands).
    w_mat, b_row = prepare_patch_embed_params(weight, bias,
                                              compute_dtype=jnp.bfloat16)

    # Reference: plain XLA conv on the NCHW / OIHW view of the same data.
    x_nchw = jnp.transpose(x_nhwc, (0, 3, 1, 2))
    ref = jax.lax.conv_general_dilated(
        x_nchw, weight, window_strides=(patch_size, patch_size),
        padding="VALID", dimension_numbers=("NCHW", "OIHW", "NCHW"))
    ref = ref + bias.reshape(1, embed_dim, 1, 1)
    num_patches = (img_size // patch_size) ** 2
    ref = ref.reshape(B, embed_dim, num_patches).transpose(0, 2, 1)

    # 1) Auto tile selection (multi-step grid, batched in-kernel matmul).
    out = patch_embed_nhwc(x_nhwc, w_mat, b_row, patch_size=patch_size)
    out = jax.block_until_ready(out)
    assert out.shape == (B, num_patches, embed_dim), out.shape
    err = float(jnp.max(jnp.abs(out.astype(jnp.float32) - ref)))
    assert err < 2e-2, f"auto-tile mismatch: max abs err = {err}"

    # 2) Ragged tiling: tm_rows=3 does not divide B*gh=4 -> cdiv grid with a
    #    masked last block (the old divisor-search fallback is gone).
    out_r = patch_embed_nhwc(x_nhwc, w_mat, b_row, patch_size=patch_size,
                             tm_rows=3)
    out_r = jax.block_until_ready(out_r)
    err_r = float(jnp.max(jnp.abs(out_r.astype(jnp.float32) - ref)))
    assert err_r < 2e-2, f"ragged-tile mismatch: max abs err = {err_r}"

    print("KERNEL_OK")
</pallas_src>

<mosaic_0001>
module attributes {stable_mosaic.version = 11 : i64} {
  func.func @_patch_embed_kernel(%arg0: i32, %arg1: memref<1x8x48xf32, #tpu.memory_space<vmem>>, %arg2: memref<192x128xbf16, #tpu.memory_space<vmem>>, %arg3: memref<1x128xf32, #tpu.memory_space<vmem>>, %arg4: memref<1x2x128xbf16, #tpu.memory_space<vmem>>, %arg5: memref<2x192xbf16, #tpu.memory_space<vmem>>) attributes {dimension_semantics = [#tpu.dimension_semantics<parallel>], iteration_bounds = array<i64: 4>, scalar_prefetch = 0 : i64, scratch_operands = 1 : i64, tpu.core_type = #tpu.core_type<tc>, window_params = [{transform_indices = @transform_0, window_bounds = array<i64: 1, 8, 48>}, {pipeline_mode = #tpu.pipeline_mode<synchronous>, transform_indices = @transform_1, window_bounds = array<i64: 192, 128>}, {pipeline_mode = #tpu.pipeline_mode<synchronous>, transform_indices = @transform_2, window_bounds = array<i64: 1, 128>}, {transform_indices = @transform_3, window_bounds = array<i64: 1, 2, 128>}]} {
    %c0 = arith.constant 0 : index
    %c0_0 = arith.constant 0 : index
    %c0_1 = arith.constant 0 : index
    %0 = vector.load %arg1[%c0, %c0_0, %c0_1] : memref<1x8x48xf32, #tpu.memory_space<vmem>>, vector<1x1x24xf32>
    %1 = vector.shape_cast %0 : vector<1x1x24xf32> to vector<1x24xf32>
    %2 = arith.truncf %1 : vector<1x24xf32> to vector<1x24xbf16>
    %c0_2 = arith.constant 0 : index
    %c0_3 = arith.constant 0 : index
    %3 = vector.load %arg5[%c0_2, %c0_3] : memref<2x192xbf16, #tpu.memory_space<vmem>>, vector<1x24xbf16>
    tpu.vector_store %arg5[%c0_2, %c0_3], %2 {strides = array<i32>} : memref<2x192xbf16, #tpu.memory_space<vmem>>, vector<1x24xbf16>,
    %c0_4 = arith.constant 0 : index
    %c1 = arith.constant 1 : index
    %c0_5 = arith.constant 0 : index
    %4 = vector.load %arg1[%c0_4, %c1, %c0_5] : memref<1x8x48xf32, #tpu.memory_space<vmem>>, vector<1x1x24xf32>
    %5 = vector.shape_cast %4 : vector<1x1x24xf32> to vector<1x24xf32>
    %6 = arith.truncf %5 : vector<1x24xf32> to vector<1x24xbf16>
    %c0_6 = arith.constant 0 : index
    %c24 = arith.constant 24 : index
    %7 = vector.load %arg5[%c0_6, %c24] : memref<2x192xbf16, #tpu.memory_space<vmem>>, vector<1x24xbf16>
    tpu.vector_store %arg5[%c0_6, %c24], %6 {strides = array<i32>} : memref<2x192xbf16, #tpu.memory_space<vmem>>, vector<1x24xbf16>,
    %c0_7 = arith.constant 0 : index
    %c2 = arith.constant 2 : index
    %c0_8 = arith.constant 0 : index
    %8 = vector.load %arg1[%c0_7, %c2, %c0_8] : memref<1x8x48xf32, #tpu.memory_space<vmem>>, vector<1x1x24xf32>
    %9 = vector.shape_cast %8 : vector<1x1x24xf32> to vector<1x24xf32>
    %10 = arith.truncf %9 : vector<1x24xf32> to vector<1x24xbf16>
    %c0_9 = arith.constant 0 : index
    %c48 = arith.constant 48 : index
    %11 = vector.load %arg5[%c0_9, %c48] : memref<2x192xbf16, #tpu.memory_space<vmem>>, vector<1x24xbf16>
    tpu.vector_store %arg5[%c0_9, %c48], %10 {strides = array<i32>} : memref<2x192xbf16, #tpu.memory_space<vmem>>, vector<1x24xbf16>,
    %c0_10 = arith.constant 0 : index
    %c3 = arith.constant 3 : index
    %c0_11 = arith.constant 0 : index
    %12 = vector.load %arg1[%c0_10, %c3, %c0_11] : memref<1x8x48xf32, #tpu.memory_space<vmem>>, vector<1x1x24xf32>
    %13 = vector.shape_cast %12 : vector<1x1x24xf32> to vector<1x24xf32>
    %14 = arith.truncf %13 : vector<1x24xf32> to vector<1x24xbf16>
    %c0_12 = arith.constant 0 : index
    %c72 = arith.constant 72 : index
    %15 = vector.load %arg5[%c0_12, %c72] : memref<2x192xbf16, #tpu.memory_space<vmem>>, vector<1x24xbf16>
    tpu.vector_store %arg5[%c0_12, %c72], %14 {strides = array<i32>} : memref<2x192xbf16, #tpu.memory_space<vmem>>, vector<1x24xbf16>,
    %c0_13 = arith.constant 0 : index
    %c4 = arith.constant 4 : index
    %c0_14 = arith.constant 0 : index
    %16 = vector.load %arg1[%c0_13, %c4, %c0_14] : memref<1x8x48xf32, #tpu.memory_space<vmem>>, vector<1x1x24xf32>
    %17 = vector.shape_cast %16 : vector<1x1x24xf32> to vector<1x24xf32>
    %18 = arith.truncf %17 : vector<1x24xf32> to vector<1x24xbf16>
    %c0_15 = arith.constant 0 : index
    %c96 = arith.constant 96 : index
    %19 = vector.load %arg5[%c0_15, %c96] : memref<2x192xbf16, #tpu.memory_space<vmem>>, vector<1x24xbf16>
    tpu.vector_store %arg5[%c0_15, %c96], %18 {strides = array<i32>} : memref<2x192xbf16, #tpu.memory_space<vmem>>, vector<1x24xbf16>,
    %c0_16 = arith.constant 0 : index
    %c5 = arith.constant 5 : index
    %c0_17 = arith.constant 0 : index
    %20 = vector.load %arg1[%c0_16, %c5, %c0_17] : memref<1x8x48xf32, #tpu.memory_space<vmem>>, vector<1x1x24xf32>
    %21 = vector.shape_cast %20 : vector<1x1x24xf32> to vector<1x24xf32>
    %22 = arith.truncf %21 : vector<1x24xf32> to vector<1x24xbf16>
    %c0_18 = arith.constant 0 : index
    %c120 = arith.constant 120 : index
    %23 = vector.load %arg5[%c0_18, %c120] : memref<2x192xbf16, #tpu.memory_space<vmem>>, vector<1x24xbf16>
    tpu.vector_store %arg5[%c0_18, %c120], %22 {strides = array<i32>} : memref<2x192xbf16, #tpu.memory_space<vmem>>, vector<1x24xbf16>,
    %c0_19 = arith.constant 0 : index
    %c6 = arith.constant 6 : index
    %c0_20 = arith.constant 0 : index
    %24 = vector.load %arg1[%c0_19, %c6, %c0_20] : memref<1x8x48xf32, #tpu.memory_space<vmem>>, vector<1x1x24xf32>
    %25 = vector.shape_cast %24 : vector<1x1x24xf32> to vector<1x24xf32>
    %26 = arith.truncf %25 : vector<1x24xf32> to vector<1x24xbf16>
    %c0_21 = arith.constant 0 : index
    %c144 = arith.constant 144 : index
    %27 = vector.load %arg5[%c0_21, %c144] : memref<2x192xbf16, #tpu.memory_space<vmem>>, vector<1x24xbf16>
    tpu.vector_store %arg5[%c0_21, %c144], %26 {strides = array<i32>} : memref<2x192xbf16, #tpu.memory_space<vmem>>, vector<1x24xbf16>,
    %c0_22 = arith.constant 0 : index
    %c7 = arith.constant 7 : index
    %c0_23 = arith.constant 0 : index
    %28 = vector.load %arg1[%c0_22, %c7, %c0_23] : memref<1x8x48xf32, #tpu.memory_space<vmem>>, vector<1x1x24xf32>
    %29 = vector.shape_cast %28 : vector<1x1x24xf32> to vector<1x24xf32>
    %30 = arith.truncf %29 : vector<1x24xf32> to vector<1x24xbf16>
    %c0_24 = arith.constant 0 : index
    %c168 = arith.constant 168 : index
    %31 = vector.load %arg5[%c0_24, %c168] : memref<2x192xbf16, #tpu.memory_space<vmem>>, vector<1x24xbf16>
    tpu.vector_store %arg5[%c0_24, %c168], %30 {strides = array<i32>} : memref<2x192xbf16, #tpu.memory_space<vmem>>, vector<1x24xbf16>,
    %c0_25 = arith.constant 0 : index
    %c0_26 = arith.constant 0 : index
    %c24_27 = arith.constant 24 : index
    %32 = vector.load %arg1[%c0_25, %c0_26, %c24_27] : memref<1x8x48xf32, #tpu.memory_space<vmem>>, vector<1x1x24xf32>
    %33 = vector.shape_cast %32 : vector<1x1x24xf32> to vector<1x24xf32>
    %34 = arith.truncf %33 : vector<1x24xf32> to vector<1x24xbf16>
    %c1_28 = arith.constant 1 : index
    %c0_29 = arith.constant 0 : index
    %35 = vector.load %arg5[%c1_28, %c0_29] : memref<2x192xbf16, #tpu.memory_space<vmem>>, vector<1x24xbf16>
    tpu.vector_store %arg5[%c1_28, %c0_29], %34 {strides = array<i32>} : memref<2x192xbf16, #tpu.memory_space<vmem>>, vector<1x24xbf16>,
    %c0_30 = arith.constant 0 : index
    %c1_31 = arith.constant 1 : index
    %c24_32 = arith.constant 24 : index
    %36 = vector.load %arg1[%c0_30, %c1_31, %c24_32] : memref<1x8x48xf32, #tpu.memory_space<vmem>>, vector<1x1x24xf32>
    %37 = vector.shape_cast %36 : vector<1x1x24xf32> to vector<1x24xf32>
    %38 = arith.truncf %37 : vector<1x24xf32> to vector<1x24xbf16>
    %c1_33 = arith.constant 1 : index
    %c24_34 = arith.constant 24 : index
    %39 = vector.load %arg5[%c1_33, %c24_34] : memref<2x192xbf16, #tpu.memory_space<vmem>>, vector<1x24xbf16>
    tpu.vector_store %arg5[%c1_33, %c24_34], %38 {strides = array<i32>} : memref<2x192xbf16, #tpu.memory_space<vmem>>, vector<1x24xbf16>,
    %c0_35 = arith.constant 0 : index
    %c2_36 = arith.constant 2 : index
    %c24_37 = arith.constant 24 : index
    %40 = vector.load %arg1[%c0_35, %c2_36, %c24_37] : memref<1x8x48xf32, #tpu.memory_space<vmem>>, vector<1x1x24xf32>
    %41 = vector.shape_cast %40 : vector<1x1x24xf32> to vector<1x24xf32>
    %42 = arith.truncf %41 : vector<1x24xf32> to vector<1x24xbf16>
    %c1_38 = arith.constant 1 : index
    %c48_39 = arith.constant 48 : index
    %43 = vector.load %arg5[%c1_38, %c48_39] : memref<2x192xbf16, #tpu.memory_space<vmem>>, vector<1x24xbf16>
    tpu.vector_store %arg5[%c1_38, %c48_39], %42 {strides = array<i32>} : memref<2x192xbf16, #tpu.memory_space<vmem>>, vector<1x24xbf16>,
    %c0_40 = arith.constant 0 : index
    %c3_41 = arith.constant 3 : index
    %c24_42 = arith.constant 24 : index
    %44 = vector.load %arg1[%c0_40, %c3_41, %c24_42] : memref<1x8x48xf32, #tpu.memory_space<vmem>>, vector<1x1x24xf32>
    %45 = vector.shape_cast %44 : vector<1x1x24xf32> to vector<1x24xf32>
    %46 = arith.truncf %45 : vector<1x24xf32> to vector<1x24xbf16>
    %c1_43 = arith.constant 1 : index
    %c72_44 = arith.constant 72 : index
    %47 = vector.load %arg5[%c1_43, %c72_44] : memref<2x192xbf16, #tpu.memory_space<vmem>>, vector<1x24xbf16>
    tpu.vector_store %arg5[%c1_43, %c72_44], %46 {strides = array<i32>} : memref<2x192xbf16, #tpu.memory_space<vmem>>, vector<1x24xbf16>,
    %c0_45 = arith.constant 0 : index
    %c4_46 = arith.constant 4 : index
    %c24_47 = arith.constant 24 : index
    %48 = vector.load %arg1[%c0_45, %c4_46, %c24_47] : memref<1x8x48xf32, #tpu.memory_space<vmem>>, vector<1x1x24xf32>
    %49 = vector.shape_cast %48 : vector<1x1x24xf32> to vector<1x24xf32>
    %50 = arith.truncf %49 : vector<1x24xf32> to vector<1x24xbf16>
    %c1_48 = arith.constant 1 : index
    %c96_49 = arith.constant 96 : index
    %51 = vector.load %arg5[%c1_48, %c96_49] : memref<2x192xbf16, #tpu.memory_space<vmem>>, vector<1x24xbf16>
    tpu.vector_store %arg5[%c1_48, %c96_49], %50 {strides = array<i32>} : memref<2x192xbf16, #tpu.memory_space<vmem>>, vector<1x24xbf16>,
    %c0_50 = arith.constant 0 : index
    %c5_51 = arith.constant 5 : index
    %c24_52 = arith.constant 24 : index
    %52 = vector.load %arg1[%c0_50, %c5_51, %c24_52] : memref<1x8x48xf32, #tpu.memory_space<vmem>>, vector<1x1x24xf32>
    %53 = vector.shape_cast %52 : vector<1x1x24xf32> to vector<1x24xf32>
    %54 = arith.truncf %53 : vector<1x24xf32> to vector<1x24xbf16>
    %c1_53 = arith.constant 1 : index
    %c120_54 = arith.constant 120 : index
    %55 = vector.load %arg5[%c1_53, %c120_54] : memref<2x192xbf16, #tpu.memory_space<vmem>>, vector<1x24xbf16>
    tpu.vector_store %arg5[%c1_53, %c120_54], %54 {strides = array<i32>} : memref<2x192xbf16, #tpu.memory_space<vmem>>, vector<1x24xbf16>,
    %c0_55 = arith.constant 0 : index
    %c6_56 = arith.constant 6 : index
    %c24_57 = arith.constant 24 : index
    %56 = vector.load %arg1[%c0_55, %c6_56, %c24_57] : memref<1x8x48xf32, #tpu.memory_space<vmem>>, vector<1x1x24xf32>
    %57 = vector.shape_cast %56 : vector<1x1x24xf32> to vector<1x24xf32>
    %58 = arith.truncf %57 : vector<1x24xf32> to vector<1x24xbf16>
    %c1_58 = arith.constant 1 : index
    %c144_59 = arith.constant 144 : index
    %59 = vector.load %arg5[%c1_58, %c144_59] : memref<2x192xbf16, #tpu.memory_space<vmem>>, vector<1x24xbf16>
    tpu.vector_store %arg5[%c1_58, %c144_59], %58 {strides = array<i32>} : memref<2x192xbf16, #tpu.memory_space<vmem>>, vector<1x24xbf16>,
    %c0_60 = arith.constant 0 : index
    %c7_61 = arith.constant 7 : index
    %c24_62 = arith.constant 24 : index
    %60 = vector.load %arg1[%c0_60, %c7_61, %c24_62] : memref<1x8x48xf32, #tpu.memory_space<vmem>>, vector<1x1x24xf32>
    %61 = vector.shape_cast %60 : vector<1x1x24xf32> to vector<1x24xf32>
    %62 = arith.truncf %61 : vector<1x24xf32> to vector<1x24xbf16>
    %c1_63 = arith.constant 1 : index
    %c168_64 = arith.constant 168 : index
    %63 = vector.load %arg5[%c1_63, %c168_64] : memref<2x192xbf16, #tpu.memory_space<vmem>>, vector<1x24xbf16>
    tpu.vector_store %arg5[%c1_63, %c168_64], %62 {strides = array<i32>} : memref<2x192xbf16, #tpu.memory_space<vmem>>, vector<1x24xbf16>,
    %c0_65 = arith.constant 0 : index
    %c0_66 = arith.constant 0 : index
    %64 = vector.load %arg5[%c0_65, %c0_66] : memref<2x192xbf16, #tpu.memory_space<vmem>>, vector<2x192xbf16>
    %c0_67 = arith.constant 0 : index
    %c0_68 = arith.constant 0 : index
    %65 = vector.load %arg2[%c0_67, %c0_68] : memref<192x128xbf16, #tpu.memory_space<vmem>>, vector<192x128xbf16>
    %cst = arith.constant dense<0.000000e+00> : vector<2x128xf32>
    %66 = tpu.matmul %64, %65, %cst {dimension_numbers = #tpu.dot_dimension_numbers<[1], [0], [0], [1], [0, 0, 1, 1], [], []>} : vector<2x192xbf16>, vector<192x128xbf16>, vector<2x128xf32> -> vector<2x128xf32>
    %c0_69 = arith.constant 0 : index
    %c0_70 = arith.constant 0 : index
    %67 = vector.load %arg3[%c0_69, %c0_70] : memref<1x128xf32, #tpu.memory_space<vmem>>, vector<1x128xf32>
    %68 = vector.broadcast %67 : vector<1x128xf32> to vector<2x128xf32>
    %69 = arith.addf %66, %68 : vector<2x128xf32>
    %70 = arith.truncf %69 : vector<2x128xf32> to vector<2x128xbf16>
    %71 = vector.extract_strided_slice %70 {offsets = [0, 0], sizes = [1, 128], strides = [1, 1]} : vector<2x128xbf16> to vector<1x128xbf16>
    %c0_71 = arith.constant 0 : index
    %c0_72 = arith.constant 0 : index
    %c0_73 = arith.constant 0 : index
    %72 = vector.load %arg4[%c0_71, %c0_72, %c0_73] : memref<1x2x128xbf16, #tpu.memory_space<vmem>>, vector<1x1x128xbf16>
    %73 = vector.shape_cast %72 : vector<1x1x128xbf16> to vector<1x128xbf16>
    %74 = vector.shape_cast %71 : vector<1x128xbf16> to vector<1x1x128xbf16>
    tpu.vector_store %arg4[%c0_71, %c0_72, %c0_73], %74 {strides = array<i32>} : memref<1x2x128xbf16, #tpu.memory_space<vmem>>, vector<1x1x128xbf16>,
    %75 = vector.extract_strided_slice %70 {offsets = [1, 0], sizes = [1, 128], strides = [1, 1]} : vector<2x128xbf16> to vector<1x128xbf16>
    %c0_74 = arith.constant 0 : index
    %c1_75 = arith.constant 1 : index
    %c0_76 = arith.constant 0 : index
    %76 = vector.load %arg4[%c0_74, %c1_75, %c0_76] : memref<1x2x128xbf16, #tpu.memory_space<vmem>>, vector<1x1x128xbf16>
    %77 = vector.shape_cast %76 : vector<1x1x128xbf16> to vector<1x128xbf16>
    %78 = vector.shape_cast %75 : vector<1x128xbf16> to vector<1x1x128xbf16>
    tpu.vector_store %arg4[%c0_74, %c1_75, %c0_76], %78 {strides = array<i32>} : memref<1x2x128xbf16, #tpu.memory_space<vmem>>, vector<1x1x128xbf16>,
    return
  }
  func.func @transform_0(%arg0: i32) -> (i32, i32, i32) {
    %c0_i32 = arith.constant 0 : i32
    %c0_i32_0 = arith.constant 0 : i32
    %c0_i32_1 = arith.constant 0 : i32
    return %arg0, %c0_i32, %c0_i32_0 : i32, i32, i32
  }
  func.func @transform_1(%arg0: i32) -> (i32, i32) {
    %c0_i32 = arith.constant 0 : i32
    %c0_i32_0 = arith.constant 0 : i32
    %c0_i32_1 = arith.constant 0 : i32
    return %c0_i32, %c0_i32_0 : i32, i32
  }
  func.func @transform_2(%arg0: i32) -> (i32, i32) {
    %c0_i32 = arith.constant 0 : i32
    %c0_i32_0 = arith.constant 0 : i32
    %c0_i32_1 = arith.constant 0 : i32
    return %c0_i32, %c0_i32_0 : i32, i32
  }
  func.func @transform_3(%arg0: i32) -> (i32, i32, i32) {
    %c0_i32 = arith.constant 0 : i32
    %c0_i32_0 = arith.constant 0 : i32
    %c0_i32_1 = arith.constant 0 : i32
    return %arg0, %c0_i32, %c0_i32_0 : i32, i32, i32
  }
}

</mosaic_0001>

<bundles_post_ra>
// kernel: tpu_custom_call.1
= control target key start
LH: loop header
LB: loop body
LE: loop exit
PB: predicated region body
PF: predicated region fallthrough
CT: control target
= control target key end

     0   :  { %8 = vsyncpa [#allocation4], 0  ;;  %s1449_s0 = inlined_call_operand.hbm [shape: f32[4,8,48], index: 0, kind: input, shape index: {}]   ;;  %s1450_s1 = inlined_call_operand.hbm [shape: bf16[192,128], index: 1, kind: input, shape index: {}]   ;;  %s1451_s2 = inlined_call_operand.vmem [shape: f32[1,128], index: 2, kind: input, shape index: {}]   ;;  %s1452_s3 = inlined_call_operand.hbm [shape: bf16[4,2,128], index: 3, kind: output, shape index: {}]  }
   0x1   :  { %10 = vsyncpa [#allocation4 + $0x1], 0 }
   0x2   :  { %11 = vsyncpa [#allocation7], 0 }
   0x3   :  { %12 = vsyncpa [#allocation5], 0 }
   0x4   :  { %14 = vsyncpa [#allocation5 + $0x1], 0  ;;  %s1156_s12 = smov 0   ;;  %s1158_s13 = smov 0  }
   0x5   :  { %s1160_s14 = smov 0   ;;  %s1162_s15 = smov 0  }
   0x6 LB: > { %s1177_s16 = sadd.s32 4294967295, %s1119_s15   ;;  %s883_s17 = sadd.s32 4294967294, %s1119_s15   ;;  %s1119_s15 = sphi %s1162_s15, %s1473_s15   ;;  %s1115_s14 = sphi %s1160_s14, %s1472_s14   ;;  %s1111_s13 = sphi %s1158_s13, %s1471_s13   ;;  %s1107_s12 = sphi %s1156_s12, %s1470_s12  }
   0x7   : > { %p40_p0 = scmp.ne.s32.totalorder %s1111_s13, %s1107_s12  ;;  %p1453_p1 = scmp.eq.s32.totalorder %s1177_s16, 0 }
   0x8   : > { %p112_p3 = scmp.eq.s32.totalorder %s883_s17, 3  ;;  %p884_p5 = scmp.ge.s32.totalorder %s1119_s15, 1 }
   0x9   : > { %p1186_p4 = por %p1453_p1, %p40_p0  ;;  %p119_p7 = scmp.lt.s32.totalorder %s1119_s15, 5 }
   0xa   : > { %p1191_p6 = por %p112_p3, %p40_p0  ;;  %s1121_s21 = smov [#allocation6]  }
   0xb   : > { %s1456_s18 = scalar_select %p1186_p4, 1, 0 }
   0xc   : > { %s1457_s19 = scalar_select %p1191_p6, 1, 0 }
   0xd   : > { %p1196_p8 = pnand %p884_p5, %p119_p7  ;;  %s131_s22 = sshll.u32 %s1121_s21, 4  ;;  %s132_s22 = int_to_ptr.vmem [resolvable:$true] %s131_s22 }
   0xe   : > { %s1209_s24 = sadd.s32 1, %s1119_s15   ;;  %s27_s25 = sadd.s32 1, %s1115_s14 }
   0xf   : > { %s1458_s20 = scalar_select %p1196_p8, 1, 0 }
  0x10   : > { %p918_p9 = pneg %p1196_p8  ;;  %s24_s26 = ssub.s32 %s1119_s15, %s1209_s24 }
  0x11   : > { %s991_s29 = scalar_lea.hbm %s1450_s1, 1536 }
  0x12   : > { %p1204_p10 = pnand %p918_p9, %p1453_p1  ;;  %p992_p11 = scmp.ne.s32.totalorder %s1450_s1, %s991_s29 }
  0x13   : > { %p998_p3 = scmp.lt.u32.totalorder %s991_s29, %s1450_s1 }
  0x14   : > { %p993_p12 = pneg %p1204_p10 }
  0x16   : > { %p994_p13 = pnand %p993_p12, %p992_p11 }
  0x18   : > { %p995_p0 = pneg %p994_p13 }
  0x1a   : > { %p1000_p5 = pnand %p998_p3, %p995_p0 }
  0x1c   : > { %1003 = shalt.err (!%p1000_p5)
}
  0x1d   : > { %s1004_s7 = scalar_lea.vmem %s132_s22, 1536  ;;  %p1012_p2 = scmp.lt.s32.totalorder %s132_s22, %s132_s22 }
  0x1e   : > { %p1005_p7 = scmp.ne.s32.totalorder %s132_s22, %s1004_s7  ;;  %p1013_p6 = scmp.lt.s32.totalorder %s1004_s7, %s1004_s7 }
  0x20   : > { %p1007_p9 = pnand %p1005_p7, %p993_p12  ;;  %p1014_p4 = por %p1013_p6, %p1012_p2 }
  0x22   : > { %p1008_p1 = pneg %p1007_p9 }
  0x24   : > { %p1015_p8 = pnand %p1014_p4, %p1008_p1 }
  0x26   : > { %1018 = shalt.err (!%p1015_p8)
}
  0x27   : > { %s1122_s8 = smov 64   ;;  %s1123_s9 = smov 4  }
  0x28   : > { %921 = dma.hbm_to_vmem [thread:$0]  (!%p1204_p10), %s1450_s1, 1536, %s132_s22, [#allocation7], %s1122_s8, %s1122_s8, %s1123_s9  }
  0x29   : > { %p25_p11 = scmp.eq.s32.totalorder %s24_s26, 0  ;;  %p34_p2 = scmp.ne.s32.totalorder %s1115_s14, %s1111_s13 }
  0x2a   : > { %p35_p1 = scmp.eq.s32.totalorder %s1119_s15, 0  ;;  %p931_p4 = scmp.lt.s32.totalorder %s1119_s15, 4 }
  0x2b   : > { %s1235_s17 = scalar_select %p25_p11, %s1115_s14, %s27_s25  }
  0x2c   : > { %p36_p6 = por %p35_p1, %p34_p2  ;;  %p1460_p8 = scmp.eq.s32.totalorder %s1177_s16, 3 }
  0x2d   : > { %s148_s27 = sand.u32 1, %s1115_s14   ;;  %s888_s28 = sshll.u32 %s1119_s15, 7 }
  0x2e   : > { %p1239_p12 = por %p1460_p8, %p34_p2  ;;  %s887_s29 = sshll.u32 %s148_s27, 3 }
  0x2f   : > { %s1248_s4 = scalar_lea.hbm %s1449_s0, %s888_s28  ;;  %s152_s22 = scalar_lea.vmem [#allocation3], %s887_s29 }
  0x30   : > { %s159_s25 = sshll.u32 %s152_s22, 4  ;;  %p1250_p10 = pnand %p931_p4, %p36_p6  ;;  %s1254_s25 = int_to_ptr.vmem [resolvable:$true] %s159_s25 }
  0x31   : > { %s149_s5 = scalar_lea.sflag [#allocation4], %s148_s27  ;;  %s1019_s6 = scalar_lea.hbm %s1248_s4, 128 }
  0x32   : > { %p1020_p13 = scmp.ne.s32.totalorder %s1248_s4, %s1019_s6  ;;  %p1021_p0 = pneg %p1250_p10 }
  0x33   : > { %s1024_s9 = scalar_lea.hbm %s1449_s0, 512  ;;  %p1025_p7 = scmp.lt.u32.totalorder %s1248_s4, %s1449_s0 }
  0x34   : > { %p1022_p3 = pnand %p1021_p0, %p1020_p13  ;;  %p1026_p9 = scmp.lt.u32.totalorder %s1024_s9, %s1019_s6 }
  0x35   : > { %p1028_p2 = scmp.lt.u32.totalorder %s1019_s6, %s1248_s4 }
  0x36   : > { %p1023_p5 = pneg %p1022_p3  ;;  %p1027_p11 = por %p1026_p9, %p1025_p7 }
  0x38   : > { %p1029_p1 = por %p1028_p2, %p1027_p11 }
  0x3a   : > { %p1030_p4 = pnand %p1029_p1, %p1023_p5 }
  0x3c   : > { %1033 = shalt.err (!%p1030_p4)
}
  0x3d   : > { %s1034_s27 = scalar_lea.vmem %s1254_s25, 128  ;;  %s1124_s28 = smov [#allocation3]  }
  0x3e   : > { %p1035_p6 = scmp.ne.s32.totalorder %s1254_s25, %s1034_s27  ;;  %s1039_s29 = sshll.u32 %s1124_s28, 4  ;;  %s1040_s29 = int_to_ptr.vmem [resolvable:$false] %s1039_s29 }
  0x3f   : > { %s1041_s23 = scalar_lea.vmem %s1040_s29, 256  ;;  %p1042_p3 = scmp.lt.s32.totalorder %s1254_s25, %s1040_s29 }
  0x40   : > { %p1037_p8 = pnand %p1035_p6, %p1021_p0  ;;  %p1043_p7 = scmp.lt.s32.totalorder %s1041_s23, %s1034_s27 }
  0x42   : > { %p1038_p13 = pneg %p1037_p8  ;;  %p1044_p9 = por %p1043_p7, %p1042_p3 }
  0x44   : > { %p1045_p11 = pnand %p1044_p9, %p1038_p13 }
  0x46   : > { %1048 = shalt.err (!%p1045_p11)
}
  0x47   : > { %925 = dma.hbm_to_vmem [thread:$0]  (!%p1250_p10), %s1248_s4, 128, %s1254_s25, %s149_s5  }
  0x48   : > { %p1463_p5 = scmp.ne.s32.totalorder %s1458_s20, 0 }
  0x49   : > { %s1284_s30 = sand.u32 (!%p1463_p5), 1, %s1111_s13   ;;  %p1464_p0 = scmp.ne.s32.totalorder (!%p1463_p5), %s1456_s18, 0 }
  0x4a   : > { %168 = sbr.rel (%p1463_p5) target bundleno = 573 (0x23d), region = 32  ;;  %s890_s22 = sshll.u32 (!%p1463_p5), %s1284_s30, 3 }
  0x4b   : > { %s171_s6 = scalar_lea.sflag (!%p1463_p5), [#allocation4], %s1284_s30  ;;  %s1288_s7 = scalar_lea.vmem (!%p1463_p5), [#allocation3], %s890_s22 }
  0x51   : > { %1094 = dma.done.wait (%p1464_p0), %s171_s6, 128  }
  0x52   : > { %1096 = vsyncadd (%p1464_p0), %s171_s6, 4294967168  ;;  %p1465_p10 = scmp.eq.s32.totalorder %s1177_s16, 0 }
  0x54   : > { %1098 = dma.done.wait (%p1465_p10), [#allocation7], 1536   ;;  %p1466_p2 = pmov %p1465_p10 }
  0x55   : > { %v215_v0 = vlaneseq  ;;  %v1125_v1 = vmov 1966171168   ;;  %v209_v6 = vld [vmem:[%s1288_s7 + $0x1] sm:$0x1]  ;;  %v234_v7 = vld [vmem:[%s1288_s7 + $0x2] sm:$0x1] }
  0x56   : > { %1100 = vsyncadd (%p1466_p2), [#allocation7], 4294965760  ;;  %v213_v2 = vunpack.c.l.s4 %v1125_v1  ;;  %v259_v8 = vld [vmem:[%s1288_s7 + $0x3] sm:$0x1]  ;;  %v210_v9 = vpack.c.bf16 %v209_v6, %v209_v6  ;;  %v235_v10 = vpack.c.bf16 %v234_v7, %v234_v7  ;;  %v284_v12 = vld [vmem:[%s1288_s7 + $0x4] sm:$0x1] }
  0x57   : > { %v216_v3 = vshrl.u32 %v215_v0, 7  ;;  %v260_v11 = vpack.c.bf16 %v259_v8, %v259_v8  ;;  %v309_v13 = vld [vmem:[%s1288_s7 + $0x5] sm:$0x1]  ;;  %v391_v14 = vld [vmem:[%s1288_s7] sm:$0x1]  ;;  %v285_v15 = vpack.c.bf16 %v284_v12, %v284_v12  ;;  %vm203_vm0 = vcmask 188416  }
  0x58   : > { %v214_v4 = vunpack.c.0.s8 %v213_v2  ;;  %v310_v16 = vpack.c.bf16 %v309_v13, %v309_v13  ;;  %v392_v17 = vpack.c.bf16 %v391_v14, %v391_v14  ;;  %v341_v21 = vld [vmem:[%s1288_s7 + $0x6] sm:$0x1]  ;;  %vm204_vm1 = vsmask.f32 256  ;;  %v366_v24 = vld [vmem:[%s1288_s7 + $0x7] sm:$0x1] }
  0x59   : > { %v444_v25 = vld [vmem:[%s1288_s7 + $0x2] sm:$0x1]  ;;  %v471_v26 = vld [vmem:[%s1288_s7 + $0x3] sm:$0x1]  ;;  %v498_v29 = vld [vmem:[%s1288_s7 + $0x4] sm:$0x1]  ;;  %v342_v34 = vpack.c.bf16 %v341_v21, %v341_v21  ;;  %v367_v42 = vpack.c.bf16 %v366_v24, %v366_v24 }
  0x5a   : > { %v1298_v5 = vsub.s32 %v214_v4, %v216_v3  ;;  %v201_v30 = vld [vmem:[%s1288_s7] sm:$0x1]  ;;  %v525_v35 = vld [vmem:[%s1288_s7 + $0x5] sm:$0x1]  ;;  %s1126_s18 = smov 24   ;;  %s1127_s20 = smov 72   ;;  %v445_v37 = vpack.c.bf16 %v444_v25, %v444_v25  ;;  %v472_v38 = vpack.c.bf16 %v471_v26, %v471_v26  ;;  %vm1328_vm2 = vmand %vm203_vm0, %vm204_vm1  ;;  %v499_v48 = vpack.c.bf16 %v498_v29, %v498_v29 }
  0x5b   : > { %v206_v39 = vld [vmem:[#allocation2] sm:$0x1]  ;;  %v558_v44 = vld [vmem:[%s1288_s7 + $0x6] sm:$0x1]  ;;  %v585_v45 = vld [vmem:[%s1288_s7 + $0x7] sm:$0x1]  ;;  %v202_v49 = vpack.c.bf16 %v201_v30, %v201_v30  ;;  %v526_v52 = vpack.c.bf16 %v525_v35, %v525_v35 }
  0x5c   : > { %v218_v18 = vrot.slane %v210_v9, %v1298_v5  ;;  %v243_v19 = vrot.slane %v235_v10, %v1298_v5  ;;  %v268_v20 = vrot.slane %v260_v11, %v1298_v5  ;;  %v293_v22 = vrot.slane %v285_v15, %v1298_v5  ;;  %s1128_s4 = smov 48   ;;  %s1129_s25 = smov 96   ;;  %v979_v11 = vld [vmem:[#allocation6] sm:$0xff]   ;;  %v980_v13 = vld [vmem:[#allocation6 + $0x8] sm:$0xff]   ;;  %v981_v14 = vld [vmem:[#allocation6 + $0x10] sm:$0xff]  }
  0x5d   : > { %v400_v23 = vrot.slane %v392_v17, %v1298_v5  ;;  %v318_v32 = vrot.slane %v310_v16, %v1298_v5  ;;  %v453_v43 = vrot.slane %v445_v37, %v1298_v5  ;;  %v350_v47 = vrot.slane %v342_v34, %v1298_v5  ;;  %s1130_s26 = smov 120   ;;  %s1131_s5 = smov 104   ;;  %v982_v15 = vld [vmem:[#allocation6 + $0x18] sm:$0xff]   ;;  %v983_v16 = vld [vmem:[#allocation6 + $0x20] sm:$0xff]   ;;  %v984_v17 = vld [vmem:[#allocation6 + $0x28] sm:$0xff]  }
  0x5e   : > { %v225_v27 = vrot.slane %v218_v18, %v1298_v5  ;;  %v275_v28 = vrot.slane %v268_v20, %v1298_v5  ;;  %v250_v31 = vrot.slane %v243_v19, %v1298_v5  ;;  %v300_v36 = vrot.slane %v293_v22, %v1298_v5  ;;  %s1132_s8 = smov 16   ;;  %s1133_s9 = smov 40   ;;  %v985_v18 = vld [vmem:[#allocation6 + $0x30] sm:$0xff]   ;;  %v986_v19 = vld [vmem:[#allocation6 + $0x38] sm:$0xff]   ;;  %v987_v20 = vld [vmem:[#allocation6 + $0x40] sm:$0xff]  }
  0x5f   : > { %v407_v33 = vrot.slane %v400_v23, %v1298_v5  ;;  %v325_v46 = vrot.slane %v318_v32, %v1298_v5  ;;  %v460_v50 = vrot.slane %v453_v43, %v1298_v5  ;;  %v480_v51 = vrot.slane %v472_v38, %v1298_v5  ;;  %v988_v21 = vld [vmem:[#allocation6 + $0x48] sm:$0xff]   ;;  %v989_v22 = vld [vmem:[#allocation6 + $0x50] sm:$0xff]   ;;  %v990_v23 = vld [vmem:[#allocation6 + $0x58] sm:$0xff]   ;;  %s199_s27 = scalar_lea.vmem [#allocation8], %s1284_s30  ;;  %s907_s28 = sshll.u32 %s1177_s16, 4 }
  0x60   : > { %226 = vrot.lane.b32.xlu0 %v225_v27, %s1126_s18  ;;  %276 = vrot.lane.b32.xlu1 %v275_v28, %s1127_s20  ;;  %v207_v53 = vsel %vm1328_vm2, %v202_v49, %v206_v39  ;;  %v357_v54 = vrot.slane %v350_v47, %v1298_v5  ;;  %v375_v55 = vrot.slane %v367_v42, %v1298_v5  ;;  %v1134_v12 = vmov 0   ;;  %s807_s29 = sshll.u32 %s199_s27, 4  ;;  %s1406_s6 = scalar_lea.hbm %s1452_s3, %s907_s28  ;;  %s1408_s29 = int_to_ptr.vmem [resolvable:$true] %s807_s29 }
  0x61   : > { %v409_v40 = vshll.u32 %v407_v33, 16  ;;  %208 = vst [vmem:[#allocation2] sm:$0x1] %v207_v53  ;;  %v559_v56 = vpack.c.bf16 %v558_v44, %v558_v44  ;;  %v586_v57 = vpack.c.bf16 %v585_v45, %v585_v45  ;;  %v462_v58 = vshll.u32 %v460_v50, 16  ;;  %744 = vmatprep.subr.bf16.mxu0 %v1134_v12  ;;  %s1135_s16 = smov [#allocation8]  }
  0x62   : > { %v487_v59 = vrot.slane %v480_v51, %v1298_v5  ;;  %v507_v60 = vrot.slane %v499_v48, %v1298_v5  ;;  %v534_v61 = vrot.slane %v526_v52, %v1298_v5  ;;  %v382_v62 = vrot.slane %v375_v55, %v1298_v5  ;;  %745 = vmatpush1.bf16.msra.mxu0 %v979_v11 }
  0x63   : > { %v567_v63 = vrot.slane %v559_v56, %v1298_v5  ;;  %v594_v3 = vrot.slane %v586_v57, %v1298_v5  ;;  %746 = vmatprep.subr.bf16.mxu0 %v1134_v12  ;;  %vm229_vm3 = vcmask 385216   ;;  %vm254_vm5 = vcmask 582016  }
  0x64   : > { %251 = vrot.lane.b32.xlu0 %v250_v31, %s1128_s4  ;;  %301 = vrot.lane.b32.xlu1 %v300_v36, %s1129_s25  ;;  %v489_v0 = vshll.u32 %v487_v59, 16  ;;  %v514_v1 = vrot.slane %v507_v60, %v1298_v5  ;;  %v541_v2 = vrot.slane %v534_v61, %v1298_v5  ;;  %vm230_vm4 = vmand %vm229_vm3, %vm204_vm1  ;;  %vm279_vm7 = vcmask 778816  }
  0x65   : > { %v574_v7 = vrot.slane %v567_v63, %v1298_v5  ;;  %v601_v8 = vrot.slane %v594_v3, %v1298_v5  ;;  %vm255_vm6 = vmand %vm254_vm5, %vm204_vm1  ;;  %vm304_vm9 = vcmask 975616   ;;  %vm332_vm11 = vcmask 1041344  }
  0x66   : > { %v516_v4 = vshll.u32 %v514_v1, 16  ;;  %v543_v6 = vshll.u32 %v541_v2, 16  ;;  %747 = vmatpush1.bf16.msra.mxu0 %v980_v13  ;;  %vm280_vm8 = vmand %vm279_vm7, %vm204_vm1  ;;  %vm334_vm12 = vcmask 123905   ;;  %vm335_vm13 = vsmask.f32 1280 }
  0x67   : > { %v576_v9 = vshll.u32 %v574_v7, 16  ;;  %v603_v10 = vshll.u32 %v601_v8, 16  ;;  %748 = vmatprep.subr.bf16.mxu0 %v1134_v12  ;;  %vm305_vm10 = vmand %vm304_vm9, %vm204_vm1  ;;  %vm329_vm2 = vcmask 982016  }
  0x68   : > { %326 = vrot.lane.b32.xlu0 %v325_v46, %s1130_s26  ;;  %411 = vrot.lane.b32.xlu1 %v409_v40, %s1131_s5  ;;  %v231_v24 = vld [vmem:[#allocation2] sm:$0x1]  ;;  %vm333_vm14 = vmand %vm332_vm11, %vm204_vm1  ;;  %v419_v40 = vld [vmem:[%s1288_s7 + $0x1] sm:$0x1]  ;;  %s795_s7 = scalar_lea.sflag [#allocation5], %s1284_s30 }
  0x69   : > { %vm336_vm15 = vmand %vm334_vm12, %vm335_vm13  ;;  %v420_v43 = vpack.c.bf16 %v419_v40, %v419_v40 }
  0x6a   : > { %749 = vmatpush1.bf16.msra.mxu0 %v981_v14 }
  0x6b   : > { %750 = vmatprep.subr.bf16.mxu0 %v1134_v12  ;;  %v428_v44 = vrot.slane %v420_v43, %v1298_v5 }
  0x6c   : > { %358 = vrot.lane.b32.xlu1 %v357_v54, %s1132_s8  ;;  %464 = vrot.lane.b32.xlu0 %v462_v58, %s1126_s18  ;;  %s1049_s18 = scalar_lea.vmem %s1408_s29, 16 }
  0x6d   : > { %v435_v50 = vrot.slane %v428_v44, %v1298_v5  ;;  %p1050_p1 = scmp.ne.s32.totalorder %s1408_s29, %s1049_s18 }
  0x6e   : > { %751 = vmatpush1.bf16.msra.mxu0 %v982_v15 }
  0x6f   : > { %752 = vmatprep.subr.bf16.mxu0 %v1134_v12  ;;  %v437_v51 = vshll.u32 %v435_v50, 16  ;;  %p1051_p4 = pnand %p1050_p1, %p1239_p12 }
  0x70   : > { %383 = vrot.lane.b32.xlu1 %v382_v62, %s1133_s9  ;;  %491 = vrot.lane.b32.xlu0 %v489_v0, %s1128_s4 }
  0x71   : > { %p1052_p6 = pneg %p1051_p4 }
  0x72   : > { %753 = vmatpush1.bf16.msra.mxu0 %v983_v16 }
  0x73   : > { %754 = vmatprep.subr.bf16.mxu0 %v1134_v12 }
  0x74   : > { %518 = vrot.lane.b32.xlu0 %v516_v4, %s1127_s20  ;;  %545 = vrot.lane.b32.xlu1 %v543_v6, %s1129_s25  ;;  %s1053_s20 = sshll.u32 %s1135_s16, 4  ;;  %s1054_s20 = int_to_ptr.vmem [resolvable:$false] %s1053_s20 }
  0x75   : > { %s1055_s4 = scalar_lea.vmem %s1054_s20, 32  ;;  %p1056_p8 = scmp.lt.s32.totalorder %s1408_s29, %s1054_s20 }
  0x76   : > { %755 = vmatpush1.bf16.msra.mxu0 %v984_v17  ;;  %p1057_p13 = scmp.lt.s32.totalorder %s1055_s4, %s1049_s18 }
  0x77   : > { %756 = vmatprep.subr.bf16.mxu0 %v1134_v12 }
  0x78   : > { %578 = vrot.lane.b32.xlu0 %v576_v9, %s1130_s26  ;;  %605 = vrot.lane.b32.xlu1 %v603_v10, %s1132_s8  ;;  %p1058_p3 = por %p1057_p13, %p1056_p8 }
  0x7a   : > { %757 = vmatpush1.bf16.msra.mxu0 %v985_v18  ;;  %v892_v18 = vld [vmem:[%s1451_s2] ss:$0 sm:$0xff]  ;;  %p1059_p7 = pnand %p1058_p3, %p1052_p6 }
  0x7b   : > { %758 = vmatprep.subr.bf16.mxu0 %v1134_v12 }
  0x7e   : > { %759 = vmatpush1.bf16.msra.mxu0 %v986_v19 }
  0x7f   : > { %760 = vmatprep.subr.bf16.mxu0 %v1134_v12 }
  0x82   : > { %761 = vmatpush1.bf16.msra.mxu0 %v987_v20 }
  0x83   : > { %762 = vmatprep.subr.bf16.mxu0 %v1134_v12 }
  0x86   : > { %763 = vmatpush1.bf16.msra.mxu0 %v988_v21 }
  0x87   : > { %764 = vmatprep.subr.bf16.mxu0 %v1134_v12 }
  0x8a   : > { %765 = vmatpush1.bf16.msra.mxu0 %v989_v22  ;;  %v787_v22 = vld [vmem:[%s199_s27] sm:$0x1] }
  0x8b   : > { %766 = vmatprep.subr.bf16.mxu0 %v1134_v12 }
  0x8e   : > { %767 = vmatpush1.bf16.msra.mxu0 %v990_v23 }
  0xd2   : > { %v227_v25 = vpop.permute.xlu0 %226  ;;  %v277_v30 = vpop.permute.xlu1 %276 }
  0xd3   : > { %v232_v26 = vsel %vm230_vm4, %v227_v25, %v231_v24  ;;  %vm337_vm4 = vmor %vm336_vm15, %vm333_vm14  ;;  %vm386_vm14 = vcmask 516416  }
  0xd4   : > { %233 = vst [vmem:[#allocation2] sm:$0x1] %v232_v26 }
  0xd6   : > { %v252_v27 = vpop.permute.xlu0 %251  ;;  %v302_v33 = vpop.permute.xlu1 %301 }
  0xda   : > { %v327_v36 = vpop.permute.xlu0 %326  ;;  %v412_v42 = vpop.permute.xlu1 %411 }
  0xdb   : > { %v256_v28 = vld [vmem:[#allocation2] sm:$0x1]  ;;  %v328_v37 = vrot.slane %v327_v36, 7 }
  0xdc   : > { %v257_v29 = vsel %vm255_vm6, %v252_v27, %v256_v28  ;;  %vm414_vm6 = vsmask.f32 7938 }
  0xdd   : > { %258 = vst [vmem:[#allocation2] sm:$0x1] %v257_v29  ;;  %v330_v38 = vsel %vm329_vm2, %v328_v37, %v327_v36  ;;  %vm440_vm15 = vmand %vm229_vm3, %vm414_vm6 }
  0xde   : > { %v359_v45 = vpop.permute.xlu1 %358  ;;  %vm467_vm2 = vmand %vm254_vm5, %vm414_vm6  ;;  %v465_v57 = vpop.permute.xlu0 %464 }
  0xdf   : > { %vm494_vm3 = vmand %vm279_vm7, %vm414_vm6  ;;  %vm548_vm7 = vcmask 785408  }
  0xe0   : > { %vm551_vm5 = vmand %vm332_vm11, %vm414_vm6  ;;  %vm740_vm11 = vcmask 523264  }
  0xe2   : > { %v384_v52 = vpop.permute.xlu1 %383  ;;  %v492_v60 = vpop.permute.xlu0 %491 }
  0xe4   : > { %v281_v31 = vld [vmem:[#allocation2] sm:$0x1] }
  0xe5   : > { %v282_v32 = vsel %vm280_vm8, %v277_v30, %v281_v31  ;;  %vm361_vm8 = vcmask 319616  }
  0xe6   : > { %283 = vst [vmem:[#allocation2] sm:$0x1] %v282_v32  ;;  %vm362_vm13 = vmand %vm361_vm8, %vm204_vm1  ;;  %v519_v63 = vpop.permute.xlu0 %518  ;;  %v546_v2 = vpop.permute.xlu1 %545 }
  0xe7   : > { %v547_v3 = vrot.slane %v546_v2, 7 }
  0xe9   : > { %v549_v4 = vsel %vm548_vm7, %v547_v3, %v546_v2 }
  0xea   : > { %v579_v8 = vpop.permute.xlu0 %578  ;;  %v606_v11 = vpop.permute.xlu1 %605 }
  0xed   : > { %v306_v34 = vld [vmem:[#allocation2] sm:$0x1] }
  0xee   : > { %v307_v35 = vsel %vm305_vm10, %v302_v33, %v306_v34  ;;  %vm415_vm10 = vmand %vm203_vm0, %vm414_vm6 }
  0xef   : > { %308 = vst [vmem:[#allocation2] sm:$0x1] %v307_v35  ;;  %vm387_vm0 = vmand %vm386_vm14, %vm204_vm1 }
  0xf6   : > { %v338_v39 = vld [vmem:[#allocation2] sm:$0x3] }
  0xf7   : > { %v339_v41 = vsel %vm337_vm4, %v330_v38, %v338_v39  ;;  %vm521_vm4 = vmand %vm304_vm9, %vm414_vm6 }
  0xf8   : > { %340 = vst [vmem:[#allocation2] sm:$0x3] %v339_v41  ;;  %vm581_vm9 = vmand %vm361_vm8, %vm414_vm6 }
  0xff   : > { %v416_v46 = vld [vmem:[#allocation2] sm:$0x1]  ;;  %v363_v47 = vld [vmem:[#allocation2 + $0x1] sm:$0x1] }
 0x100   : > { %v417_v48 = vsel %vm415_vm10, %v412_v42, %v416_v46  ;;  %v364_v49 = vsel %vm362_vm13, %v359_v45, %v363_v47  ;;  %vm552_vm10 = vsmask.f32 7942 }
 0x101   : > { %418 = vst [vmem:[#allocation2] sm:$0x1] %v417_v48  ;;  %365 = vst [vmem:[#allocation2 + $0x1] sm:$0x1] %v364_v49 }
 0x102   : > { %vm553_vm13 = vmand %vm334_vm12, %vm552_vm10  ;;  %vm785_vm12 = vcmask 1040384  }
 0x103   : > { %vm786_vm8 = vmand %vm785_vm12, %vm204_vm1 }
 0x108   : > { %v441_v53 = vld [vmem:[#allocation2] sm:$0x1]  ;;  %v388_v54 = vld [vmem:[#allocation2 + $0x1] sm:$0x1] }
 0x109   : > { %v442_v55 = vsel %vm440_vm15, %v437_v51, %v441_v53  ;;  %v389_v56 = vsel %vm387_vm0, %v384_v52, %v388_v54  ;;  %vm554_vm15 = vmor %vm553_vm13, %vm551_vm5 }
 0x10a   : > { %443 = vst [vmem:[#allocation2] sm:$0x1] %v442_v55  ;;  %390 = vst [vmem:[#allocation2 + $0x1] sm:$0x1] %v389_v56 }
 0x10b   : > { %vm608_vm0 = vmand %vm386_vm14, %vm414_vm6 }
 0x10c   : > { %vm790_vm14 = vmand %vm785_vm12, %vm414_vm6 }
 0x111   : > { %v468_v58 = vld [vmem:[#allocation2] sm:$0x1] }
 0x112   : > { %v469_v59 = vsel %vm467_vm2, %v465_v57, %v468_v58 }
 0x113   : > { %470 = vst [vmem:[#allocation2] sm:$0x1] %v469_v59 }
 0x11a   : > { %v495_v61 = vld [vmem:[#allocation2] sm:$0x1] }
 0x11b   : > { %v496_v62 = vsel %vm494_vm3, %v492_v60, %v495_v61 }
 0x11c   : > { %497 = vst [vmem:[#allocation2] sm:$0x1] %v496_v62 }
 0x123   : > { %v522_v0 = vld [vmem:[#allocation2] sm:$0x1] }
 0x124   : > { %v523_v1 = vsel %vm521_vm4, %v519_v63, %v522_v0 }
 0x125   : > { %524 = vst [vmem:[#allocation2] sm:$0x1] %v523_v1 }
 0x12c   : > { %v555_v6 = vld [vmem:[#allocation2] sm:$0x3] }
 0x12d   : > { %v556_v7 = vsel %vm554_vm15, %v549_v4, %v555_v6 }
 0x12e   : > { %557 = vst [vmem:[#allocation2] sm:$0x3] %v556_v7 }
 0x135   : > { %v582_v9 = vld [vmem:[#allocation2 + $0x1] sm:$0x1] }
 0x136   : > { %v583_v10 = vsel %vm581_vm9, %v579_v8, %v582_v9 }
 0x137   : > { %584 = vst [vmem:[#allocation2 + $0x1] sm:$0x1] %v583_v10 }
 0x13e   : > { %v609_v12 = vld [vmem:[#allocation2 + $0x1] sm:$0x1] }
 0x13f   : > { %v610_v13 = vsel %vm608_vm0, %v606_v11, %v609_v12 }
 0x140   : > { %611 = vst [vmem:[#allocation2 + $0x1] sm:$0x1] %v610_v13 }
 0x147   : > { %v893_v14 = vld.sshfl [vmem:[#allocation2] sm:$0x11 pattern:$0x75316420] }
 0x148   : > { %v652_v15 = vcombine.high %v893_v14, %v893_v14  ;;  %v659_v17 = vrot.slane %v893_v14, %v1298_v5 }
 0x14a   : > { %v666_v16 = vrot.slane %v652_v15, %v1298_v5 }
 0x14c   : > { %906 = vmatprep.mubr.msk.bf16.mxu0 %vm740_vm11, %v666_v16 }
 0x14d   : > { %777 = vmatmul.mubr.bf16.vlgmr.msra.gmra.mrb[0].mxu0 %v659_v17 }
 0x220   : > { %v778_v19 = vpop.f32.mrb[0].mxu0 }
 0x221   : > { %v779_v20 = vadd.f32 %v892_v18, %v778_v19  ;;  %v780_v21 = vpop.f32.mrb[1].mxu0 }
 0x222   : > { %v781_v23 = vpop.f32.mrb[2].mxu0 }
 0x223   : > { %v784_v24 = vpack.c.bf16 %v779_v20, %v779_v20  ;;  %v782_v5 = vpop.f32.mrb[3].mxu0 }
 0x225   : > { %v788_v25 = vsel %vm786_vm8, %v784_v24, %v787_v22 }
 0x226   : > { %789 = vst [vmem:[%s199_s27] sm:$0x1] %v788_v25 }
 0x22d   : > { %v791_v26 = vld [vmem:[%s199_s27] sm:$0x1] }
 0x22e   : > { %v792_v27 = vsel %vm790_vm14, %v784_v24, %v791_v26 }
 0x22f   : > { %793 = vst [vmem:[%s199_s27] sm:$0x1] %v792_v27 }
 0x230   : > { %1062 = shalt.err (!%p1059_p7)
}
 0x231   : > { %s1063_s30 = scalar_lea.hbm %s1406_s6, 16  ;;  %s1067_s5 = scalar_lea.hbm %s1452_s3, 64 }
 0x232   : > { %p1064_p9 = scmp.ne.s32.totalorder %s1406_s6, %s1063_s30  ;;  %p1068_p0 = scmp.lt.u32.totalorder %s1406_s6, %s1452_s3 }
 0x233   : > { %p1069_p10 = scmp.lt.u32.totalorder %s1067_s5, %s1063_s30  ;;  %p1071_p1 = scmp.lt.u32.totalorder %s1063_s30, %s1406_s6 }
 0x234   : > { %p1065_p11 = pnand %p1064_p9, %p1239_p12 }
 0x235   : > { %p1070_p2 = por %p1069_p10, %p1068_p0 }
 0x236   : > { %p1066_p5 = pneg %p1065_p11 }
 0x237   : > { %p1072_p4 = por %p1071_p1, %p1070_p2 }
 0x239   : > { %p1073_p6 = pnand %p1072_p4, %p1066_p5 }
 0x23b   : > { %1076 = shalt.err (!%p1073_p6)
}
 0x23c   : > { %916 = dma.vmem_to_hbm [thread:$0]  (%p1239_p12), %s1408_s29, 16, %s1406_s6, %s795_s7  }
 0x23d PF: > { %p933_p8 = scmp.ge.s32.totalorder %s1119_s15, 2  ;;  %s819_s10 = sand.u32 1, %s1107_s12  }
 0x23e   : > { %p1469_p13 = scmp.ne.s32.totalorder %s1457_s19, 0  ;;  %s820_s11 = scalar_lea.sflag [#allocation5], %s819_s10 }
 0x240   : > { %p927_p3 = pnand %p933_p8, %p1469_p13 }
 0x242   : > { %1102 = dma.done.wait (!%p927_p3), %s820_s11, 16  }
 0x243   : > { %1104 = vsyncadd (!%p927_p3), %s820_s11, 4294967280  ;;  %p17_p7 = scmp.ge.s32.totalorder %s1209_s24, 6   ;;  %s1470_s12 = smov %s1111_s13 }
 0x244   : > { %s1471_s13 = smov %s1115_s14  ;;  %s1472_s14 = smov %s1235_s17 }
 0x245   : > { %s1473_s15 = smov %s1209_s24  ;;  %19 = sbr.rel (!%p17_p7) target bundleno = 6 (0x6), region = 81 }
 0x24c   :  { %824 = vsyncpa [#allocation4], 1 }
 0x24d   :  { %826 = vsyncpa [#allocation4 + $0x1], 1 }
 0x24e   :  { %827 = vsyncpa [#allocation7], 1 }
 0x24f   :  { %828 = vsyncpa [#allocation5], 1 }
 0x250   :  { %830 = vsyncpa [#allocation5 + $0x1], 1 }

</bundles_post_ra>
